<compile_context>
chip_gen: v5e
topology: v5e:2x2
jax: 0.10.0
libtpu: 0.0.40
codegen_flags: <defaults>
</compile_context>

<pallas_src>
import functools

import jax
import jax.numpy as jnp
from jax.experimental import pallas as pl
from jax.experimental.pallas import tpu as pltpu

MARGIN = 0.2
EPS = 1e-6     # matches F.pairwise_distance default eps (added to the difference)
_LANE = 128


def _triplet_loss_kernel(a_ref, p_ref, n_ref, psum_ref, *,
                         batch, block_rows, pack, dim, margin, eps):
    i = pl.program_id(0)

    # Native-dtype tiles arrive via DMA; upcast to f32 for the math.
    a = a_ref[...].astype(jnp.float32)          # (block_rows, pack*dim)
    p = p_ref[...].astype(jnp.float32)
    n = n_ref[...].astype(jnp.float32)

    # pairwise_distance(p=2): sqrt(sum((x1 - x2 + eps)^2, axis=-1))
    dpos = a - p + eps
    dneg = a - n + eps
    sq_pos = dpos * dpos
    sq_neg = dneg * dneg

    # Logical row index of segment 0 of every packed row in this tile (one iota total).
    row = jax.lax.broadcasted_iota(jnp.int32, (block_rows, 1), 0)
    base = (i * block_rows + row) * pack

    total = jnp.float32(0.0)
    for c in range(pack):                       # statically unrolled; pack == 1 for D >= 128
        sl = slice(c * dim, (c + 1) * dim)      # static lane slice of one logical row
        ss_pos = jnp.sum(sq_pos[:, sl], axis=-1, keepdims=True)   # (block_rows, 1)
        ss_neg = jnp.sum(sq_neg[:, sl], axis=-1, keepdims=True)
        hinge = jnp.maximum(jnp.sqrt(ss_pos) - jnp.sqrt(ss_neg) + margin, 0.0)
        # Mask AFTER the hinge: padded / garbage rows may hold Inf/NaN, but jnp.where
        # does not propagate values from the unselected branch.
        hinge = jnp.where(base + c < batch, hinge, 0.0)
        total = total + jnp.sum(hinge)

    # Lane-dense (8, 128) partial-sum tile for this grid step (summed in the wrapper).
    psum_ref[...] = jnp.full(psum_ref.shape, total, dtype=jnp.float32)


def _tpu_vmem_bytes():
    """Physical VMEM of the current chip; conservative (v7x = 64 MiB) fallback."""
    default = 64 * 1024 * 1024
    try:
        info = pltpu.get_tpu_info()
    except Exception:
        return default
    for attr in ("vmem_capacity_bytes", "vmem_size_bytes", "vmem_bytes"):
        v = getattr(info, attr, None)
        if v:
            return int(v)
    return default


def _sublane(itemsize):
    # f32 -> 8, bf16 -> 16, int8/fp8 -> 32 (sublane packing of narrow dtypes).
    return max(8, 32 // max(1, itemsize))


def _choose_block_rows(rows_total, packed_dim, itemsize, vmem_bytes):
    """Biggest batch tile such that 3 inputs x 2 pipeline buffers fit the VMEM budget.

    Footprint uses the *padded* row size (lanes rounded up to 128) so small-D lane
    padding can't blow past the scoped limit once blocks are large.
    """
    lane_padded = ((packed_dim + _LANE - 1) // _LANE) * _LANE
    row_bytes = lane_padded * itemsize
    sub = _sublane(itemsize)
    # Keep the buffered input working set well under physical VMEM (room for the
    # output buffers, temporaries and compiler overhead): ~35 MiB on v7x, 48 MiB else.
    buffered_budget = min(int(0.55 * vmem_bytes), 48 * 1024 * 1024)
    per_block_budget = buffered_budget // (3 * 2)       # 3 inputs x double buffering
    rows = (per_block_budget // row_bytes) // sub * sub
    rows = max(sub, int(rows))
    if rows >= rows_total:
        return rows_total                                # full extent is always legal
    return rows


def _vmem_limit_bytes(vmem_bytes, buffered_bytes):
    """Scoped-VMEM request: comfortably above the working set, capped below physical."""
    want = buffered_bytes + (16 << 20)
    return int(min(max(want, 32 << 20), int(0.75 * vmem_bytes)))


def triplet_loss(anchor, positive, negative, margin=MARGIN, block_rows=None):
    """Triplet loss (scalar f32) via a tiled, pipelined Pallas TPU kernel.

    anchor/positive/negative: (B, D) arrays (f32 or bf16; kept narrow through the DMA).
    `block_rows` counts *packed* rows when D < 128 (pack = 128 // D logical rows each).
    """
    B, D = anchor.shape
    assert positive.shape == (B, D) and negative.shape == (B, D)
    itemsize = jnp.dtype(anchor.dtype).itemsize

    # Lane packing for small D: fold `pack` logical rows into one lane-dense row.
    pack = max(1, _LANE // D) if D < _LANE else 1
    if pack > 1:
        rows_packed = -(-B // pack)
        b_padded = rows_packed * pack
        if b_padded != B:                     # zero-pad so the reshape is exact
            padcfg = ((0, b_padded - B), (0, 0))
            anchor = jnp.pad(anchor, padcfg)
            positive = jnp.pad(positive, padcfg)
            negative = jnp.pad(negative, padcfg)
        packed_dim = pack * D
        anchor = anchor.reshape(rows_packed, packed_dim)      # free row-major reshape
        positive = positive.reshape(rows_packed, packed_dim)
        negative = negative.reshape(rows_packed, packed_dim)
    else:
        rows_packed, packed_dim = B, D

    vmem_bytes = _tpu_vmem_bytes()
    if block_rows is None:
        block_rows = _choose_block_rows(rows_packed, packed_dim, itemsize, vmem_bytes)
    else:
        block_rows = min(int(block_rows), rows_packed)
        if block_rows < rows_packed:
            sub = _sublane(itemsize)
            block_rows = max(8, (block_rows // 8) * 8)
            block_rows = min(block_rows, rows_packed)
            del sub

    num_tiles = pl.cdiv(rows_packed, block_rows)

    lane_padded = ((packed_dim + _LANE - 1) // _LANE) * _LANE
    block_bytes = block_rows * lane_padded * itemsize
    buffered_bytes = 3 * 2 * block_bytes + 2 * 8 * _LANE * 4
    vmem_limit = _vmem_limit_bytes(vmem_bytes, buffered_bytes)

    kernel = functools.partial(
        _triplet_loss_kernel,
        batch=B, block_rows=block_rows, pack=pack, dim=D,
        margin=float(margin), eps=EPS)

    in_spec = pl.BlockSpec((block_rows, packed_dim), lambda i: (i, 0))
    partials = pl.pallas_call(
        kernel,
        out_shape=jax.ShapeDtypeStruct((num_tiles, 8, _LANE), jnp.float32),
        grid=(num_tiles,),
        in_specs=[in_spec, in_spec, in_spec],
        out_specs=pl.BlockSpec((1, 8, _LANE), lambda i: (i, 0, 0)),
        compiler_params=pltpu.CompilerParams(
            dimension_semantics=("parallel",),        # megacore-shards batch tiles on v7x
            vmem_limit_bytes=vmem_limit,              # override 16/32 MiB scoped defaults
        ),
        cost_estimate=pl.CostEstimate(
            flops=8 * B * D,
            transcendentals=2 * B,
            bytes_accessed=3 * rows_packed * packed_dim * itemsize
                           + num_tiles * 8 * _LANE * 4,
        ),
    )(anchor, positive, negative)

    # Exact mean: sum of per-tile partial sums, one divide by the true batch size.
    return jnp.sum(partials[:, 0, 0]) / B


def _triplet_loss_ref(anchor, positive, negative, margin=MARGIN):
    a = anchor.astype(jnp.float32)
    p = positive.astype(jnp.float32)
    n = negative.astype(jnp.float32)
    pos = jnp.sqrt(jnp.sum((a - p + EPS) ** 2, axis=-1))
    neg = jnp.sqrt(jnp.sum((a - n + EPS) ** 2, axis=-1))
    return jnp.mean(jnp.maximum(pos - neg + margin, 0.0))


if __name__ == "__main__":
    keys = jax.random.split(jax.random.PRNGKey(0), 9)

    # 1) Small embeddings: batch=20, hidden=32  -> lane-packed path (pack=4).
    B, D = 20, 32
    anchor = jax.random.normal(keys[0], (B, D), dtype=jnp.float32)
    positive = jax.random.normal(keys[1], (B, D), dtype=jnp.float32)
    negative = jax.random.normal(keys[2], (B, D), dtype=jnp.float32)

    loss = triplet_loss(anchor, positive, negative)
    jax.block_until_ready(loss)
    ref = _triplet_loss_ref(anchor, positive, negative)
    assert jnp.allclose(loss, ref, atol=1e-5, rtol=1e-5), (loss, ref)

    # bf16-streaming path (inputs stay bf16 through the DMA, f32 math in-kernel).
    a16, p16, n16 = (x.astype(jnp.bfloat16) for x in (anchor, positive, negative))
    loss16 = triplet_loss(a16, p16, n16)
    jax.block_until_ready(loss16)
    ref16 = _triplet_loss_ref(a16, p16, n16)
    assert jnp.allclose(loss16, ref16, atol=1e-3, rtol=1e-3), (loss16, ref16)

    # 2) Batch not a multiple of pack + forced multi-step grid (pack padding + tail mask).
    B2, D2 = 37, 32
    a2 = jax.random.normal(keys[3], (B2, D2), dtype=jnp.float32)
    p2 = jax.random.normal(keys[4], (B2, D2), dtype=jnp.float32)
    n2 = jax.random.normal(keys[5], (B2, D2), dtype=jnp.float32)
    loss2 = triplet_loss(a2, p2, n2, block_rows=8)   # 10 packed rows -> 2 grid steps
    jax.block_until_ready(loss2)
    ref2 = _triplet_loss_ref(a2, p2, n2)
    assert jnp.allclose(loss2, ref2, atol=1e-5, rtol=1e-5), (loss2, ref2)

    # 3) D >= 128 (no packing; plain row reduction), non-multiple-of-128 feature dim.
    B3, D3 = 24, 160
    a3 = jax.random.normal(keys[6], (B3, D3), dtype=jnp.float32)
    p3 = jax.random.normal(keys[7], (B3, D3), dtype=jnp.float32)
    n3 = jax.random.normal(keys[8], (B3, D3), dtype=jnp.float32)
    loss3 = triplet_loss(a3, p3, n3)
    jax.block_until_ready(loss3)
    ref3 = _triplet_loss_ref(a3, p3, n3)
    assert jnp.allclose(loss3, ref3, atol=1e-5, rtol=1e-5), (loss3, ref3)

    print("KERNEL_OK")
</pallas_src>

<mosaic_0001>
module attributes {stable_mosaic.version = 11 : i64} {
  func.func @_triplet_loss_kernel(%arg0: i32, %arg1: memref<5x128xf32, #tpu.memory_space<vmem>>, %arg2: memref<5x128xf32, #tpu.memory_space<vmem>>, %arg3: memref<5x128xf32, #tpu.memory_space<vmem>>, %arg4: memref<1x8x128xf32, #tpu.memory_space<vmem>>) attributes {dimension_semantics = [#tpu.dimension_semantics<parallel>], iteration_bounds = array<i64: 1>, scalar_prefetch = 0 : i64, scratch_operands = 0 : i64, tpu.core_type = #tpu.core_type<tc>, window_params = [{transform_indices = @transform_0, window_bounds = array<i64: 5, 128>}, {transform_indices = @transform_1, window_bounds = array<i64: 5, 128>}, {transform_indices = @transform_2, window_bounds = array<i64: 5, 128>}, {transform_indices = @transform_3, window_bounds = array<i64: 1, 8, 128>}]} {
    %c0 = arith.constant 0 : index
    %c0_0 = arith.constant 0 : index
    %0 = vector.load %arg1[%c0, %c0_0] : memref<5x128xf32, #tpu.memory_space<vmem>>, vector<5x128xf32>
    %c0_1 = arith.constant 0 : index
    %c0_2 = arith.constant 0 : index
    %1 = vector.load %arg2[%c0_1, %c0_2] : memref<5x128xf32, #tpu.memory_space<vmem>>, vector<5x128xf32>
    %c0_3 = arith.constant 0 : index
    %c0_4 = arith.constant 0 : index
    %2 = vector.load %arg3[%c0_3, %c0_4] : memref<5x128xf32, #tpu.memory_space<vmem>>, vector<5x128xf32>
    %3 = arith.subf %0, %1 : vector<5x128xf32>
    %cst = arith.constant 9.99999997E-7 : f32
    %4 = vector.broadcast %cst : f32 to vector<5x128xf32>
    %5 = arith.addf %3, %4 : vector<5x128xf32>
    %6 = arith.subf %0, %2 : vector<5x128xf32>
    %cst_5 = arith.constant 9.99999997E-7 : f32
    %7 = vector.broadcast %cst_5 : f32 to vector<5x128xf32>
    %8 = arith.addf %6, %7 : vector<5x128xf32>
    %9 = arith.mulf %5, %5 : vector<5x128xf32>
    %10 = arith.mulf %8, %8 : vector<5x128xf32>
    %11 = tpu.iota {dimensions = array<i32: 0>} : vector<5x1xi32>
    %c5_i32 = arith.constant 5 : i32
    %12 = arith.muli %arg0, %c5_i32 : i32
    %13 = vector.broadcast %12 : i32 to vector<5x1xi32>
    %14 = arith.addi %13, %11 : vector<5x1xi32>
    %c4_i32 = arith.constant 4 : i32
    %15 = vector.broadcast %c4_i32 : i32 to vector<5x1xi32>
    %16 = arith.muli %14, %15 : vector<5x1xi32>
    %17 = vector.extract_strided_slice %9 {offsets = [0, 0], sizes = [5, 32], strides = [1, 1]} : vector<5x128xf32> to vector<5x32xf32>
    %cst_6 = arith.constant dense<0.000000e+00> : vector<5xf32>
    %18 = vector.multi_reduction <add>, %17, %cst_6 [1] : vector<5x32xf32> to vector<5xf32>
    %19 = vector.shape_cast %18 : vector<5xf32> to vector<5x1xf32>
    %20 = vector.extract_strided_slice %10 {offsets = [0, 0], sizes = [5, 32], strides = [1, 1]} : vector<5x128xf32> to vector<5x32xf32>
    %cst_7 = arith.constant dense<0.000000e+00> : vector<5xf32>
    %21 = vector.multi_reduction <add>, %20, %cst_7 [1] : vector<5x32xf32> to vector<5xf32>
    %22 = vector.shape_cast %21 : vector<5xf32> to vector<5x1xf32>
    %23 = math.sqrt %19 : vector<5x1xf32>
    %24 = math.sqrt %22 : vector<5x1xf32>
    %25 = arith.subf %23, %24 : vector<5x1xf32>
    %cst_8 = arith.constant 2.000000e-01 : f32
    %26 = vector.broadcast %cst_8 : f32 to vector<5x1xf32>
    %27 = arith.addf %25, %26 : vector<5x1xf32>
    %cst_9 = arith.constant 0.000000e+00 : f32
    %28 = vector.broadcast %cst_9 : f32 to vector<5x1xf32>
    %29 = arith.maximumf %27, %28 : vector<5x1xf32>
    %c0_i32 = arith.constant 0 : i32
    %30 = vector.broadcast %c0_i32 : i32 to vector<5x1xi32>
    %31 = arith.addi %16, %30 : vector<5x1xi32>
    %c20_i32 = arith.constant 20 : i32
    %32 = vector.broadcast %c20_i32 : i32 to vector<5x1xi32>
    %33 = arith.cmpi slt, %31, %32 : vector<5x1xi32>
    %cst_10 = arith.constant 0.000000e+00 : f32
    %34 = vector.broadcast %cst_10 : f32 to vector<5x1xf32>
    %35 = arith.select %33, %29, %34 : vector<5x1xi1>, vector<5x1xf32>
    %36 = vector.shape_cast %35 : vector<5x1xf32> to vector<1x5x1xf32>
    %cst_11 = arith.constant dense<0.000000e+00> : vector<1xf32>
    %37 = vector.multi_reduction <add>, %36, %cst_11 [1, 2] : vector<1x5x1xf32> to vector<1xf32>
    %38 = vector.shape_cast %37 : vector<1xf32> to vector<1x1x1xf32>
    %39 = vector.extract %38[0, 0, 0] : f32 from vector<1x1x1xf32>
    %cst_12 = arith.constant 0.000000e+00 : f32
    %40 = arith.addf %cst_12, %39 : f32
    %41 = vector.extract_strided_slice %9 {offsets = [0, 32], sizes = [5, 32], strides = [1, 1]} : vector<5x128xf32> to vector<5x32xf32>
    %cst_13 = arith.constant dense<0.000000e+00> : vector<5xf32>
    %42 = vector.multi_reduction <add>, %41, %cst_13 [1] : vector<5x32xf32> to vector<5xf32>
    %43 = vector.shape_cast %42 : vector<5xf32> to vector<5x1xf32>
    %44 = vector.extract_strided_slice %10 {offsets = [0, 32], sizes = [5, 32], strides = [1, 1]} : vector<5x128xf32> to vector<5x32xf32>
    %cst_14 = arith.constant dense<0.000000e+00> : vector<5xf32>
    %45 = vector.multi_reduction <add>, %44, %cst_14 [1] : vector<5x32xf32> to vector<5xf32>
    %46 = vector.shape_cast %45 : vector<5xf32> to vector<5x1xf32>
    %47 = math.sqrt %43 : vector<5x1xf32>
    %48 = math.sqrt %46 : vector<5x1xf32>
    %49 = arith.subf %47, %48 : vector<5x1xf32>
    %cst_15 = arith.constant 2.000000e-01 : f32
    %50 = vector.broadcast %cst_15 : f32 to vector<5x1xf32>
    %51 = arith.addf %49, %50 : vector<5x1xf32>
    %cst_16 = arith.constant 0.000000e+00 : f32
    %52 = vector.broadcast %cst_16 : f32 to vector<5x1xf32>
    %53 = arith.maximumf %51, %52 : vector<5x1xf32>
    %c1_i32 = arith.constant 1 : i32
    %54 = vector.broadcast %c1_i32 : i32 to vector<5x1xi32>
    %55 = arith.addi %16, %54 : vector<5x1xi32>
    %c20_i32_17 = arith.constant 20 : i32
    %56 = vector.broadcast %c20_i32_17 : i32 to vector<5x1xi32>
    %57 = arith.cmpi slt, %55, %56 : vector<5x1xi32>
    %cst_18 = arith.constant 0.000000e+00 : f32
    %58 = vector.broadcast %cst_18 : f32 to vector<5x1xf32>
    %59 = arith.select %57, %53, %58 : vector<5x1xi1>, vector<5x1xf32>
    %60 = vector.shape_cast %59 : vector<5x1xf32> to vector<1x5x1xf32>
    %cst_19 = arith.constant dense<0.000000e+00> : vector<1xf32>
    %61 = vector.multi_reduction <add>, %60, %cst_19 [1, 2] : vector<1x5x1xf32> to vector<1xf32>
    %62 = vector.shape_cast %61 : vector<1xf32> to vector<1x1x1xf32>
    %63 = vector.extract %62[0, 0, 0] : f32 from vector<1x1x1xf32>
    %64 = arith.addf %40, %63 : f32
    %65 = vector.extract_strided_slice %9 {offsets = [0, 64], sizes = [5, 32], strides = [1, 1]} : vector<5x128xf32> to vector<5x32xf32>
    %cst_20 = arith.constant dense<0.000000e+00> : vector<5xf32>
    %66 = vector.multi_reduction <add>, %65, %cst_20 [1] : vector<5x32xf32> to vector<5xf32>
    %67 = vector.shape_cast %66 : vector<5xf32> to vector<5x1xf32>
    %68 = vector.extract_strided_slice %10 {offsets = [0, 64], sizes = [5, 32], strides = [1, 1]} : vector<5x128xf32> to vector<5x32xf32>
    %cst_21 = arith.constant dense<0.000000e+00> : vector<5xf32>
    %69 = vector.multi_reduction <add>, %68, %cst_21 [1] : vector<5x32xf32> to vector<5xf32>
    %70 = vector.shape_cast %69 : vector<5xf32> to vector<5x1xf32>
    %71 = math.sqrt %67 : vector<5x1xf32>
    %72 = math.sqrt %70 : vector<5x1xf32>
    %73 = arith.subf %71, %72 : vector<5x1xf32>
    %cst_22 = arith.constant 2.000000e-01 : f32
    %74 = vector.broadcast %cst_22 : f32 to vector<5x1xf32>
    %75 = arith.addf %73, %74 : vector<5x1xf32>
    %cst_23 = arith.constant 0.000000e+00 : f32
    %76 = vector.broadcast %cst_23 : f32 to vector<5x1xf32>
    %77 = arith.maximumf %75, %76 : vector<5x1xf32>
    %c2_i32 = arith.constant 2 : i32
    %78 = vector.broadcast %c2_i32 : i32 to vector<5x1xi32>
    %79 = arith.addi %16, %78 : vector<5x1xi32>
    %c20_i32_24 = arith.constant 20 : i32
    %80 = vector.broadcast %c20_i32_24 : i32 to vector<5x1xi32>
    %81 = arith.cmpi slt, %79, %80 : vector<5x1xi32>
    %cst_25 = arith.constant 0.000000e+00 : f32
    %82 = vector.broadcast %cst_25 : f32 to vector<5x1xf32>
    %83 = arith.select %81, %77, %82 : vector<5x1xi1>, vector<5x1xf32>
    %84 = vector.shape_cast %83 : vector<5x1xf32> to vector<1x5x1xf32>
    %cst_26 = arith.constant dense<0.000000e+00> : vector<1xf32>
    %85 = vector.multi_reduction <add>, %84, %cst_26 [1, 2] : vector<1x5x1xf32> to vector<1xf32>
    %86 = vector.shape_cast %85 : vector<1xf32> to vector<1x1x1xf32>
    %87 = vector.extract %86[0, 0, 0] : f32 from vector<1x1x1xf32>
    %88 = arith.addf %64, %87 : f32
    %89 = vector.extract_strided_slice %9 {offsets = [0, 96], sizes = [5, 32], strides = [1, 1]} : vector<5x128xf32> to vector<5x32xf32>
    %cst_27 = arith.constant dense<0.000000e+00> : vector<5xf32>
    %90 = vector.multi_reduction <add>, %89, %cst_27 [1] : vector<5x32xf32> to vector<5xf32>
    %91 = vector.shape_cast %90 : vector<5xf32> to vector<5x1xf32>
    %92 = vector.extract_strided_slice %10 {offsets = [0, 96], sizes = [5, 32], strides = [1, 1]} : vector<5x128xf32> to vector<5x32xf32>
    %cst_28 = arith.constant dense<0.000000e+00> : vector<5xf32>
    %93 = vector.multi_reduction <add>, %92, %cst_28 [1] : vector<5x32xf32> to vector<5xf32>
    %94 = vector.shape_cast %93 : vector<5xf32> to vector<5x1xf32>
    %95 = math.sqrt %91 : vector<5x1xf32>
    %96 = math.sqrt %94 : vector<5x1xf32>
    %97 = arith.subf %95, %96 : vector<5x1xf32>
    %cst_29 = arith.constant 2.000000e-01 : f32
    %98 = vector.broadcast %cst_29 : f32 to vector<5x1xf32>
    %99 = arith.addf %97, %98 : vector<5x1xf32>
    %cst_30 = arith.constant 0.000000e+00 : f32
    %100 = vector.broadcast %cst_30 : f32 to vector<5x1xf32>
    %101 = arith.maximumf %99, %100 : vector<5x1xf32>
    %c3_i32 = arith.constant 3 : i32
    %102 = vector.broadcast %c3_i32 : i32 to vector<5x1xi32>
    %103 = arith.addi %16, %102 : vector<5x1xi32>
    %c20_i32_31 = arith.constant 20 : i32
    %104 = vector.broadcast %c20_i32_31 : i32 to vector<5x1xi32>
    %105 = arith.cmpi slt, %103, %104 : vector<5x1xi32>
    %cst_32 = arith.constant 0.000000e+00 : f32
    %106 = vector.broadcast %cst_32 : f32 to vector<5x1xf32>
    %107 = arith.select %105, %101, %106 : vector<5x1xi1>, vector<5x1xf32>
    %108 = vector.shape_cast %107 : vector<5x1xf32> to vector<1x5x1xf32>
    %cst_33 = arith.constant dense<0.000000e+00> : vector<1xf32>
    %109 = vector.multi_reduction <add>, %108, %cst_33 [1, 2] : vector<1x5x1xf32> to vector<1xf32>
    %110 = vector.shape_cast %109 : vector<1xf32> to vector<1x1x1xf32>
    %111 = vector.extract %110[0, 0, 0] : f32 from vector<1x1x1xf32>
    %112 = arith.addf %88, %111 : f32
    %113 = vector.broadcast %112 : f32 to vector<1x8x128xf32>
    %c0_34 = arith.constant 0 : index
    %c0_35 = arith.constant 0 : index
    %c0_36 = arith.constant 0 : index
    %114 = vector.load %arg4[%c0_34, %c0_35, %c0_36] : memref<1x8x128xf32, #tpu.memory_space<vmem>>, vector<1x8x128xf32>
    tpu.vector_store %arg4[%c0_34, %c0_35, %c0_36], %113 {strides = array<i32>} : memref<1x8x128xf32, #tpu.memory_space<vmem>>, vector<1x8x128xf32>,
    return
  }
  func.func @transform_0(%arg0: i32) -> (i32, i32) {
    %c0_i32 = arith.constant 0 : i32
    %c0_i32_0 = arith.constant 0 : i32
    return %arg0, %c0_i32 : i32, i32
  }
  func.func @transform_1(%arg0: i32) -> (i32, i32) {
    %c0_i32 = arith.constant 0 : i32
    %c0_i32_0 = arith.constant 0 : i32
    return %arg0, %c0_i32 : i32, i32
  }
  func.func @transform_2(%arg0: i32) -> (i32, i32) {
    %c0_i32 = arith.constant 0 : i32
    %c0_i32_0 = arith.constant 0 : i32
    return %arg0, %c0_i32 : i32, i32
  }
  func.func @transform_3(%arg0: i32) -> (i32, i32, i32) {
    %c0_i32 = arith.constant 0 : i32
    %c0_i32_0 = arith.constant 0 : i32
    %c0_i32_1 = arith.constant 0 : i32
    return %arg0, %c0_i32, %c0_i32_0 : i32, i32, i32
  }
}

</mosaic_0001>

<bundles_post_ra>
// kernel: tpu_custom_call.1
= control target key start
LH: loop header
LB: loop body
LE: loop exit
PB: predicated region body
PF: predicated region fallthrough
CT: control target
= control target key end

     0   :  { %8 = vsyncpa [#allocation3], 0  ;;  %s550_s0 = inlined_call_operand.hbm [shape: f32[5,128], index: 0, kind: input, shape index: {}]   ;;  %s551_s1 = inlined_call_operand.hbm [shape: f32[5,128], index: 1, kind: input, shape index: {}]   ;;  %s552_s2 = inlined_call_operand.hbm [shape: f32[5,128], index: 2, kind: input, shape index: {}]   ;;  %s553_s3 = inlined_call_operand.hbm [shape: f32[1,8,128], index: 3, kind: output, shape index: {}]  }
   0x1   :  { %9 = vsyncpa [#allocation6], 0  ;;  %s27_s14 = sshll.u32 %s551_s1, 4  ;;  %s28_s14 = int_to_ptr.hbm [resolvable:$true] %s27_s14 }
   0x2   :  { %10 = vsyncpa [#allocation4], 0  ;;  %s433_s15 = smov [#allocation5]   ;;  %s16_s19 = sshll.u32 %s550_s0, 4  ;;  %s17_s19 = int_to_ptr.hbm [resolvable:$true] %s16_s19 }
   0x3   :  { %s29_s16 = sshll.u32 %s433_s15, 4  ;;  %s434_s20 = smov [#allocation2]   ;;  %s30_s16 = int_to_ptr.vmem [resolvable:$true] %s29_s16 }
   0x4   :  { %32 = dma.hbm_to_vmem [thread:$0]  %s28_s14, 128, %s30_s16, [#allocation6]  }
   0x5   :  { %s18_s21 = sshll.u32 %s434_s20, 4  ;;  %s38_s24 = sshll.u32 %s552_s2, 4  ;;  %s19_s21 = int_to_ptr.vmem [resolvable:$true] %s18_s21  ;;  %s39_s24 = int_to_ptr.hbm [resolvable:$true] %s38_s24 }
   0x6   :  { %21 = dma.hbm_to_vmem [thread:$0]  %s17_s19, 128, %s19_s21, [#allocation3]  }
   0x7   :  { %s435_s1 = smov [#allocation7]  }
   0x8   :  { %s40_s25 = sshll.u32 %s435_s1, 4  ;;  %s41_s25 = int_to_ptr.vmem [resolvable:$true] %s40_s25 }
   0x9   :  { %43 = dma.hbm_to_vmem [thread:$0]  %s39_s24, 128, %s41_s25, [#allocation6]  }
   0xa   :  { %427 = dma.done.wait [#allocation3], 128  }
   0xb   :  { %428 = vsyncadd [#allocation3], 4294967168 }
   0xc   :  { %429 = dma.done.wait [#allocation6], 256  }
   0xd   :  { %430 = vsyncadd [#allocation6], 4294967040  ;;  %v56_v0 = vld [vmem:[#allocation2] sm:$0x1f]  ;;  %v57_v1 = vld [vmem:[#allocation5] sm:$0x1f]  ;;  %v65_v43 = vlaneseq }
   0xe   :  { %v58_v2 = vld [vmem:[#allocation7] sm:$0x1f]  ;;  %v59_v3 = vsub.f32 %v56_v0, %v57_v1  ;;  %s436_s0 = smov 64   ;;  %s437_s2 = smov 96   ;;  %vm71_vm0 = vcmask 258048   ;;  %vm107_vm6 = vcmask 4096  }
   0xf   :  { %v61_v5 = vsub.f32 %v56_v0, %v58_v2  ;;  %s438_s26 = smov 32   ;;  %v66_v47 = vshrl.u32 %v65_v43, 7  ;;  %s289_s6 = sshll.u32 %s553_s3, 4  ;;  %s290_s6 = int_to_ptr.hbm [resolvable:$true] %s289_s6 }
  0x10   :  { %v60_v4 = vadd.f32 1e-06, %v59_v3  ;;  %s439_s8 = smov [#allocation8]  }
  0x11   :  { %v62_v7 = vadd.f32 1e-06, %v61_v5  ;;  %v477_v49 = vmul.u32 4, %v66_v47  ;;  %s287_s9 = sshll.u32 %s439_s8, 4  ;;  %s288_s9 = int_to_ptr.vmem [resolvable:$true] %s287_s9 }
  0x12   :  { %v63_v6 = vmul.f32 %v60_v4, %v60_v4 }
  0x13   :  { %v64_v8 = vmul.f32 %v62_v7, %v62_v7  ;;  %vm105_vm5 = vcmp.lt.s32.totalorder %v477_v49, 20 }
  0x14   :  { %174 = vrot.lane.b32.xlu1 %v63_v6, %s436_s0  ;;  %120 = vrot.lane.b32.xlu0 %v63_v6, %s437_s2  ;;  %v72_v10 = vsel %vm71_vm0, %v63_v6, 0.0 }
  0x15   :  { %227 = vrot.lane.b32.xlu2 %v63_v6, %s438_s26  ;;  %v75_v9 = vsel %vm71_vm0, %v64_v8, 0.0 }
  0x1c   :  { %180 = vrot.lane.b32.xlu1 %v64_v8, %s436_s0  ;;  %127 = vrot.lane.b32.xlu0 %v64_v8, %s437_s2 }
  0x1d   :  { %233 = vrot.lane.b32.xlu2 %v64_v8, %s438_s26 }
  0x46   :  { %76 = vadd.xlane.f32.xlu1 %v75_v9  ;;  %73 = vadd.xlane.f32.xlu0 %v72_v10 }
  0x6f   :  { %v228_v11 = vpop.permute.xlu2 %227 }
  0x70   :  { %v230_v22 = vsel %vm71_vm0, %v228_v11, 0.0 }
  0x77   :  { %v234_v16 = vpop.permute.xlu2 %233 }
  0x78   :  { %v236_v19 = vsel %vm71_vm0, %v234_v16, 0.0 }
  0x86   :  { %v175_v12 = vpop.permute.xlu1 %174  ;;  %v121_v13 = vpop.permute.xlu0 %120 }
  0x87   :  { %v123_v14 = vsel %vm71_vm0, %v121_v13, 0.0  ;;  %v177_v15 = vsel %vm71_vm0, %v175_v12, 0.0 }
  0x88   :  { %124 = vadd.xlane.f32.xlu2 %v123_v14  ;;  %178 = vadd.xlane.f32.xlu0 %v177_v15 }
  0x8e   :  { %v181_v17 = vpop.permute.xlu1 %180  ;;  %v128_v18 = vpop.permute.xlu0 %127 }
  0x8f   :  { %v183_v20 = vsel %vm71_vm0, %v181_v17, 0.0  ;;  %v130_v21 = vsel %vm71_vm0, %v128_v18, 0.0 }
  0x90   :  { %184 = vadd.xlane.f32.xlu1 %v183_v20  ;;  %131 = vadd.xlane.f32.xlu2 %v130_v21 }
  0x91   :  { %237 = vadd.xlane.f32.xlu0 %v236_v19 }
  0x98   :  { %231 = vadd.xlane.f32.xlu2 %v230_v22 }
  0xb9   :  { %v77_v23 = vpop.xlane.xlu1 %76  ;;  %v74_v24 = vpop.xlane.xlu0 %73 }
  0xba   :  { %315 = vrsqrt.f32 %v77_v23  ;;  %vm85_vm1 = vcmp.eq.f32.partialorder %v74_v24, inf  ;;  %v88_v39 = vand.u32 2147483648, %v74_v24  ;;  %vm97_vm2 = vcmp.eq.f32.partialorder %v77_v23, inf }
  0xbb   :  { %317 = vrsqrt.f32 %v74_v24  ;;  %v100_v40 = vand.u32 2147483648, %v77_v23  ;;  %vm87_vm3 = vcmp.eq.f32.partialorder %v74_v24, 0.0  ;;  %vm99_vm4 = vcmp.eq.f32.partialorder %v77_v23, 0.0 }
  0xc0   :  { %v316_v25 = vpop.eup %315 }
  0xc1   :  { %v318_v26 = vpop.eup %317  ;;  %v91_v27 = vmul.f32 %v316_v25, %v77_v23 }
  0xc2   :  { %v79_v28 = vmul.f32 %v318_v26, %v74_v24 }
  0xc3   :  { %v92_v30 = vmul.f32 %v316_v25, %v91_v27  ;;  %v160_v27 = vadd.s32 1, %v477_v49 }
  0xc4   :  { %v80_v29 = vmul.f32 %v318_v26, %v79_v28 }
  0xc5   :  { %v93_v32 = vmul.f32 0.5, %v92_v30  ;;  %vm161_vm15 = vcmp.lt.s32.totalorder %v160_v27, 20 }
  0xc6   :  { %v81_v31 = vmul.f32 0.5, %v80_v29 }
  0xc7   :  { %v94_v34 = vsub.f32 1.5, %v93_v32  ;;  %v213_v32 = vadd.s32 2, %v477_v49 }
  0xc8   :  { %v82_v33 = vsub.f32 1.5, %v81_v31 }
  0xc9   :  { %v95_v36 = vmul.f32 %v316_v25, %v94_v34  ;;  %vm214_vm0 = vcmp.lt.s32.totalorder %v213_v32, 20 }
  0xca   :  { %v83_v35 = vmul.f32 %v318_v26, %v82_v33 }
  0xcb   :  { %v96_v38 = vmul.f32 %v95_v36, %v77_v23 }
  0xcc   :  { %v84_v37 = vmul.f32 %v83_v35, %v74_v24 }
  0xcd   :  { %v98_v42 = vsel %vm97_vm2, %v77_v23, %v96_v38 }
  0xce   :  { %v86_v41 = vsel %vm85_vm1, %v74_v24, %v84_v37  ;;  %v101_v45 = vsel %vm99_vm4, %v100_v40, %v98_v42 }
  0xcf   :  { %v89_v44 = vsel %vm87_vm3, %v88_v39, %v86_v41 }
  0xd0   :  { %v102_v46 = vsub.f32 %v89_v44, %v101_v45 }
  0xd2   :  { %v103_v48 = vadd.f32 0.2, %v102_v46 }
  0xd4   :  { %v104_v50 = vmax.f32 %v103_v48, 0.0 }
  0xd6   :  { %v106_v51 = vsel %vm105_vm5, %v104_v50, 0.0 }
  0xd7   :  { %v108_v52 = vsel %vm107_vm6, %v106_v51, 0.0 }
  0xd8   :  { %109 = vadd.xlane.f32.xlu1 %v108_v52 }
  0xfb   :  { %v481_v53 = vpop.xlane.xlu2 %124  ;;  %v483_v54 = vpop.xlane.xlu0 %178 }
  0xfc   :  { %319 = vrsqrt.f32 %v481_v53  ;;  %vm140_vm7 = vcmp.eq.f32.partialorder %v481_v53, inf  ;;  %vm142_vm8 = vcmp.eq.f32.partialorder %v481_v53, 0.0  ;;  %v143_v19 = vand.u32 2147483648, %v481_v53 }
  0xfd   :  { %321 = vrsqrt.f32 %v483_v54  ;;  %vm193_vm9 = vcmp.eq.f32.partialorder %v483_v54, inf  ;;  %vm195_vm10 = vcmp.eq.f32.partialorder %v483_v54, 0.0  ;;  %v196_v25 = vand.u32 2147483648, %v483_v54 }
 0x102   :  { %v320_v55 = vpop.eup %319 }
 0x103   :  { %v322_v56 = vpop.eup %321  ;;  %v134_v57 = vmul.f32 %v320_v55, %v481_v53  ;;  %v488_v58 = vpop.xlane.xlu1 %184 }
 0x104   :  { %v490_v59 = vpop.xlane.xlu2 %131  ;;  %v187_v60 = vmul.f32 %v322_v56, %v483_v54  ;;  %323 = vrsqrt.f32 %v488_v58  ;;  %v494_v61 = vpop.xlane.xlu0 %237  ;;  %vm205_vm13 = vcmp.eq.f32.partialorder %v488_v58, inf  ;;  %v208_v38 = vand.u32 2147483648, %v488_v58 }
 0x105   :  { %325 = vrsqrt.f32 %v490_v59  ;;  %v135_v62 = vmul.f32 %v320_v55, %v134_v57  ;;  %vm152_vm11 = vcmp.eq.f32.partialorder %v490_v59, inf  ;;  %vm154_vm12 = vcmp.eq.f32.partialorder %v490_v59, 0.0 }
 0x106   :  { %327 = vrsqrt.f32 %v494_v61  ;;  %v188_v63 = vmul.f32 %v322_v56, %v187_v60  ;;  %v155_v39 = vand.u32 2147483648, %v490_v59  ;;  %vm207_vm14 = vcmp.eq.f32.partialorder %v488_v58, 0.0 }
 0x107   :  { %v136_v0 = vmul.f32 0.5, %v135_v62  ;;  %vm258_vm1 = vcmp.eq.f32.partialorder %v494_v61, inf  ;;  %vm260_vm2 = vcmp.eq.f32.partialorder %v494_v61, 0.0  ;;  %v261_v60 = vand.u32 2147483648, %v494_v61 }
 0x108   :  { %v189_v1 = vmul.f32 0.5, %v188_v63 }
 0x109   :  { %v137_v2 = vsub.f32 1.5, %v136_v0  ;;  %v266_v0 = vadd.s32 3, %v477_v49 }
 0x10a   :  { %v324_v3 = vpop.eup %323  ;;  %v190_v4 = vsub.f32 1.5, %v189_v1 }
 0x10b   :  { %v326_v5 = vpop.eup %325  ;;  %v199_v6 = vmul.f32 %v324_v3, %v488_v58  ;;  %v138_v10 = vmul.f32 %v320_v55, %v137_v2  ;;  %vm267_vm5 = vcmp.lt.s32.totalorder %v266_v0, 20 }
 0x10c   :  { %v499_v7 = vpop.xlane.xlu2 %231  ;;  %v328_v8 = vpop.eup %327  ;;  %v146_v9 = vmul.f32 %v326_v5, %v490_v59  ;;  %v191_v12 = vmul.f32 %v322_v56, %v190_v4 }
 0x10d   :  { %329 = vrsqrt.f32 %v499_v7  ;;  %v252_v11 = vmul.f32 %v328_v8, %v494_v61  ;;  %v200_v13 = vmul.f32 %v324_v3, %v199_v6  ;;  %v139_v17 = vmul.f32 %v138_v10, %v481_v53 }
 0x10e   :  { %v147_v14 = vmul.f32 %v326_v5, %v146_v9  ;;  %v192_v20 = vmul.f32 %v191_v12, %v483_v54  ;;  %vm246_vm3 = vcmp.eq.f32.partialorder %v499_v7, inf  ;;  %vm248_vm4 = vcmp.eq.f32.partialorder %v499_v7, 0.0 }
 0x10f   :  { %v201_v15 = vmul.f32 0.5, %v200_v13  ;;  %v253_v16 = vmul.f32 %v328_v8, %v252_v11  ;;  %v141_v30 = vsel %vm140_vm7, %v481_v53, %v139_v17 }
 0x110   :  { %v148_v18 = vmul.f32 0.5, %v147_v14  ;;  %v194_v33 = vsel %vm193_vm9, %v483_v54, %v192_v20  ;;  %v144_v42 = vsel %vm142_vm8, %v143_v19, %v141_v30 }
 0x111   :  { %v202_v21 = vsub.f32 1.5, %v201_v15  ;;  %v254_v22 = vmul.f32 0.5, %v253_v16  ;;  %v197_v44 = vsel %vm195_vm10, %v196_v25, %v194_v33 }
 0x112   :  { %v149_v24 = vsub.f32 1.5, %v148_v18 }
 0x113   :  { %v330_v23 = vpop.eup %329  ;;  %v203_v28 = vmul.f32 %v324_v3, %v202_v21  ;;  %v255_v29 = vsub.f32 1.5, %v254_v22 }
 0x114   :  { %v240_v26 = vmul.f32 %v330_v23, %v499_v7  ;;  %v150_v31 = vmul.f32 %v326_v5, %v149_v24 }
 0x115   :  { %v204_v34 = vmul.f32 %v203_v28, %v488_v58  ;;  %v256_v36 = vmul.f32 %v328_v8, %v255_v29 }
 0x116   :  { %v241_v35 = vmul.f32 %v330_v23, %v240_v26  ;;  %v151_v37 = vmul.f32 %v150_v31, %v490_v59 }
 0x117   :  { %v206_v40 = vsel %vm205_vm13, %v488_v58, %v204_v34  ;;  %v257_v50 = vmul.f32 %v256_v36, %v494_v61 }
 0x118   :  { %v242_v41 = vmul.f32 0.5, %v241_v35  ;;  %v153_v43 = vsel %vm152_vm11, %v490_v59, %v151_v37  ;;  %v209_v45 = vsel %vm207_vm14, %v208_v38, %v206_v40  ;;  %v249_v59 = vand.u32 2147483648, %v499_v7 }
 0x119   :  { %v156_v46 = vsel %vm154_vm12, %v155_v39, %v153_v43  ;;  %v210_v47 = vsub.f32 %v197_v44, %v209_v45  ;;  %v259_v54 = vsel %vm258_vm1, %v494_v61, %v257_v50 }
 0x11a   :  { %v243_v48 = vsub.f32 1.5, %v242_v41  ;;  %v157_v51 = vsub.f32 %v144_v42, %v156_v46  ;;  %v262_v4 = vsel %vm260_vm2, %v261_v60, %v259_v54 }
 0x11b   :  { %v211_v52 = vadd.f32 0.2, %v210_v47 }
 0x11c   :  { %v244_v55 = vmul.f32 %v330_v23, %v243_v48  ;;  %v158_v56 = vadd.f32 0.2, %v157_v51 }
 0x11d   :  { %v212_v53 = vmax.f32 %v211_v52, 0.0 }
 0x11e   :  { %v245_v57 = vmul.f32 %v244_v55, %v499_v7  ;;  %v159_v58 = vmax.f32 %v158_v56, 0.0 }
 0x11f   :  { %v215_v62 = vsel %vm214_vm0, %v212_v53, 0.0 }
 0x120   :  { %v247_v63 = vsel %vm246_vm3, %v499_v7, %v245_v57  ;;  %v162_v1 = vsel %vm161_vm15, %v159_v58, 0.0  ;;  %v216_v2 = vsel %vm107_vm6, %v215_v62, 0.0 }
 0x121   :  { %v250_v3 = vsel %vm248_vm4, %v249_v59, %v247_v63  ;;  %v163_v5 = vsel %vm107_vm6, %v162_v1, 0.0  ;;  %217 = vadd.xlane.f32.xlu0 %v216_v2 }
 0x122   :  { %v263_v6 = vsub.f32 %v250_v3, %v262_v4  ;;  %164 = vadd.xlane.f32.xlu2 %v163_v5 }
 0x124   :  { %v264_v8 = vadd.f32 0.2, %v263_v6 }
 0x126   :  { %v265_v61 = vmax.f32 %v264_v8, 0.0 }
 0x128   :  { %v268_v9 = vsel %vm267_vm5, %v265_v61, 0.0 }
 0x129   :  { %v269_v10 = vsel %vm107_vm6, %v268_v9, 0.0 }
 0x12a   :  { %270 = vadd.xlane.f32.xlu1 %v269_v10 }
 0x14b   :  { %v110_v7 = vpop.xlane.xlu1 %109 }
 0x14c   :  { %v111_v11 = vrot.slane %v110_v7, 4 }
 0x14e   :  { %v112_v49 = vadd.f32 %v111_v11, %v110_v7 }
 0x150   :  { %v113_v12 = vrot.slane %v112_v49, 2 }
 0x152   :  { %v114_v13 = vadd.f32 %v113_v12, %v112_v49 }
 0x154   :  { %v115_v14 = vrot.slane %v114_v13, 1 }
 0x156   :  { %v116_v15 = vadd.f32 %v115_v14, %v114_v13 }
 0x158   :  { %300 = vpush %v116_v15 }
 0x189   :  { %s301_s27 = spop %300 }
 0x194   :  { %v218_v16 = vpop.xlane.xlu0 %217 }
 0x195   :  { %v165_v17 = vpop.xlane.xlu2 %164  ;;  %v219_v18 = vrot.slane %v218_v16, 4 }
 0x196   :  { %v166_v19 = vrot.slane %v165_v17, 4 }
 0x197   :  { %v220_v20 = vadd.f32 %v219_v18, %v218_v16 }
 0x198   :  { %v167_v21 = vadd.f32 %v166_v19, %v165_v17 }
 0x199   :  { %v221_v22 = vrot.slane %v220_v20, 2 }
 0x19a   :  { %v168_v23 = vrot.slane %v167_v21, 2 }
 0x19b   :  { %v222_v24 = vadd.f32 %v221_v22, %v220_v20 }
 0x19c   :  { %v169_v25 = vadd.f32 %v168_v23, %v167_v21 }
 0x19d   :  { %v271_v26 = vpop.xlane.xlu1 %270  ;;  %v223_v28 = vrot.slane %v222_v24, 1 }
 0x19e   :  { %v272_v27 = vrot.slane %v271_v26, 4  ;;  %v170_v29 = vrot.slane %v169_v25, 1 }
 0x19f   :  { %v224_v31 = vadd.f32 %v223_v28, %v222_v24 }
 0x1a0   :  { %v273_v30 = vadd.f32 %v272_v27, %v271_v26  ;;  %v171_v32 = vadd.f32 %v170_v29, %v169_v25 }
 0x1a2   :  { %v274_v33 = vrot.slane %v273_v30, 2  ;;  %302 = vpush %v171_v32 }
 0x1a3   :  { %304 = vpush %v224_v31 }
 0x1a4   :  { %v275_v34 = vadd.f32 %v274_v33, %v273_v30 }
 0x1a6   :  { %v276_v35 = vrot.slane %v275_v34, 1 }
 0x1a8   :  { %v277_v36 = vadd.f32 %v276_v35, %v275_v34 }
 0x1aa   :  { %306 = vpush %v277_v36 }
 0x1d3   :  { %s303_s28 = spop %302 }
 0x1d4   :  { %s173_s29 = sadd.f32 %s303_s28, %s301_s27  ;;  %s305_s30 = spop %304 }
 0x1d6   :  { %s226_s7 = sadd.f32 %s305_s30, %s173_s29 }
 0x1db   :  { %s307_s10 = spop %306 }
 0x1dc   :  { %s279_s11 = sadd.f32 %s307_s10, %s226_s7 }
 0x1de   :  { %v280_v37 = vstv %s279_s11 }
 0x1df   :  { %281 = vst [vmem:[#allocation8] sm:$0xff] %v280_v37 }
 0x1e0   :  { %292 = dma.vmem_to_hbm [thread:$0]  %s288_s9, 128, %s290_s6, [#allocation4]  }
 0x1e1   :  { %431 = dma.done.wait [#allocation4], 128  }
 0x1e2   :  { %432 = vsyncadd [#allocation4], 4294967168 }
 0x1e3   :  { %297 = vsyncpa [#allocation3], 1 }
 0x1e4   :  { %298 = vsyncpa [#allocation6], 1 }
 0x1e5   :  { %299 = vsyncpa [#allocation4], 1 }

</bundles_post_ra>
